<compile_context>
chip_gen: v6e
topology: v6e:2x2x1
jax: 0.10.0
libtpu: 0.0.40
codegen_flags: <defaults>
</compile_context>

<pallas_src>
import jax
import jax.numpy as jnp
from jax.experimental import pallas as pl
from jax.experimental.pallas import tpu as pltpu


def _round_up(n, m):
    return ((n + m - 1) // m) * m


def _vmem_budget_bytes():
    """~75% of per-core VMEM (48 MiB on v7x, 96 MiB on v5e/v6e)."""
    try:
        cap = pltpu.get_tpu_info().vmem_capacity_bytes
    except Exception:
        cap = 64 << 20  # conservative fallback (v7x-sized)
    return int(cap) * 3 // 4


def _mlp_block_kernel(x_ref, w12_ref, wo_ref, o_ref):
    # x_ref:   (tm, E_pad)   bf16 input rows (E zero-padded to 128 lanes)
    # w12_ref: (E_pad, 2F)   bf16 fused [W1^T | W2^T], K-major
    # wo_ref:  (F, E_pad)    bf16 fc_out^T, K-major (padded output cols are zero)
    # o_ref:   (tm, E_pad)   f32 output rows
    ffn = wo_ref.shape[0]
    x = x_ref[...]

    # Single MXU pass for both gate projections (standard M,K @ K,N contraction).
    s12 = jnp.dot(x, w12_ref[...], preferred_element_type=jnp.float32)  # (tm, 2F) f32

    split1 = s12[:, :ffn]
    split2 = s12[:, ffn:]

    # SiLU(a) = a * sigmoid(a); EUP exp + approx reciprocal, gate on the VPU (f32).
    sig = pl.reciprocal(1.0 + jnp.exp(-split1), approx=True)
    gated = (split1 * sig) * split2                                      # (tm, F) f32

    # fc_out: (tm, F) @ (F, E_pad); padded columns of wo are zero -> zeros out.
    out = jnp.dot(gated.astype(wo_ref.dtype), wo_ref[...],
                  preferred_element_type=jnp.float32)                    # (tm, E_pad)

    o_ref[...] = out.astype(o_ref.dtype)


def prepare_mlp_weights(w1, w2, w_out, compute_dtype=jnp.bfloat16):
    """One-time parameter prep (hoisted out of the forward path).

    w1, w2: (F, E) nn.Linear (out, in) layout.  w_out: (E, F).
    Returns (w12_km, wo_km):
      w12_km: (E_pad, 2F) bf16, K-major fused gate weight.
      wo_km:  (F, E_pad)  bf16, K-major fc_out weight (padded cols zero).
    """
    F, E = w1.shape
    E_pad = _round_up(E, 128)
    w12 = jnp.concatenate([w1.T, w2.T], axis=1)        # (E, 2F), K-major
    wo = w_out.T                                        # (F, E),  K-major
    if E_pad != E:
        w12 = jnp.pad(w12, ((0, E_pad - E), (0, 0)))
        wo = jnp.pad(wo, ((0, 0), (0, E_pad - E)))
    return w12.astype(compute_dtype), wo.astype(compute_dtype)


def mlp_block_prepared(x, w12_km, wo_km, *, tm=1024):
    """x: [B, S, E].  w12_km: [E_pad, 2F], wo_km: [F, E_pad] from prepare_mlp_weights.
    Returns [B, S, E] in x.dtype."""
    B, S, E = x.shape
    E_pad, two_f = w12_km.shape
    F = two_f // 2
    assert wo_km.shape == (F, E_pad)
    M = B * S

    compute_dtype = w12_km.dtype
    cd = jnp.dtype(compute_dtype).itemsize
    od = jnp.dtype(x.dtype).itemsize

    # --- derive the row tile from the VMEM budget -----------------------------
    budget = _vmem_budget_bytes()
    # Resident (double-buffered) weights.
    weight_bytes = 2 * (E_pad * 2 * F + F * E_pad) * cd
    # Per-row cost: double-buffered x/out tiles + f32 intermediates (with margin).
    per_row = 2 * E_pad * cd + 2 * E_pad * od + (4 * F + 2 * E_pad) * 4
    avail = budget - weight_bytes - (8 << 20)
    tm_fit = max(8, (avail // per_row) // 8 * 8) if avail > 0 else 8

    tm_eff = min(int(tm), int(tm_fit), _round_up(M, 8))
    tm_eff = max(8, (tm_eff // 8) * 8)
    # v7x megacore: keep >= 2 grid steps when the problem is large enough that
    # halving the tile stays in the efficient (>=512-row) regime.
    if M >= 2 * 512:
        tm_eff = min(tm_eff, _round_up((M + 1) // 2, 8))

    m_pad = _round_up(M, tm_eff)
    grid = (m_pad // tm_eff,)

    # --- lane-dense input: pad rows to the grid and E to 128 ------------------
    x2d = x.reshape(M, E).astype(compute_dtype)
    x2d = jnp.pad(x2d, ((0, m_pad - M), (0, E_pad - E)))

    # --- VMEM limit: actual need + headroom, never the whole v7x VMEM ---------
    need = weight_bytes + tm_eff * per_row + (8 << 20)
    vmem_limit = int(min(max(need, 16 << 20), budget))

    cost = pl.CostEstimate(
        flops=2 * m_pad * (E_pad * 2 * F + F * E_pad),
        transcendentals=m_pad * F,
        bytes_accessed=(E_pad * 2 * F + F * E_pad) * cd + m_pad * E_pad * (cd + od),
    )

    out2d = pl.pallas_call(
        _mlp_block_kernel,
        out_shape=jax.ShapeDtypeStruct((m_pad, E_pad), x.dtype),
        grid_spec=pltpu.PrefetchScalarGridSpec(
            num_scalar_prefetch=0,
            grid=grid,
            in_specs=[
                pl.BlockSpec((tm_eff, E_pad), lambda i: (i, 0)),   # x rows
                pl.BlockSpec((E_pad, 2 * F), lambda i: (0, 0)),    # fused gate W, resident
                pl.BlockSpec((F, E_pad), lambda i: (0, 0)),        # W_out^T, resident
            ],
            out_specs=pl.BlockSpec((tm_eff, E_pad), lambda i: (i, 0)),
        ),
        compiler_params=pltpu.CompilerParams(
            dimension_semantics=("parallel",),     # row tiles shard across TCs (v7x)
            vmem_limit_bytes=vmem_limit),
        cost_estimate=cost,
    )(x2d, w12_km, wo_km)

    return out2d[:M, :E].reshape(B, S, E)


def mlp_block(x, w1, w2, w_out, *, tm=1024, compute_dtype=jnp.bfloat16):
    """Convenience wrapper for raw PyTorch-layout weights (prep done per call;
    prefer prepare_mlp_weights + mlp_block_prepared in a real forward path)."""
    w12_km, wo_km = prepare_mlp_weights(w1, w2, w_out, compute_dtype)
    return mlp_block_prepared(x, w12_km, wo_km, tm=tm)


def _reference_mlp(x, w1, w2, w_out):
    a = jnp.einsum("bse,fe->bsf", x, w1)
    b = jnp.einsum("bse,fe->bsf", x, w2)
    g = jax.nn.silu(a) * b
    return jnp.einsum("bsf,ef->bse", g, w_out)


if __name__ == "__main__":
    # TransformerConfig defaults: embedding_dim=64, widening_factor=4 -> ffn_dim=256
    B, S, E = 2, 8, 64
    F = E * 4

    key = jax.random.PRNGKey(0)
    kx, k1, k2, k3 = jax.random.split(key, 4)

    x = jax.random.normal(kx, (B, S, E), dtype=jnp.float32)
    # nn.Linear weight shapes: (out_features, in_features).
    w1 = jax.random.normal(k1, (F, E), dtype=jnp.float32) * (1.0 / E) ** 0.5
    w2 = jax.random.normal(k2, (F, E), dtype=jnp.float32) * (1.0 / E) ** 0.5
    w_out = jax.random.normal(k3, (E, F), dtype=jnp.float32) * (1.0 / F) ** 0.5

    # One-time weight prep (hoisted out of the forward path), then a jitted forward.
    w12_km, wo_km = prepare_mlp_weights(w1, w2, w_out)
    fwd = jax.jit(mlp_block_prepared)

    out = fwd(x, w12_km, wo_km)
    out = jax.block_until_ready(out)

    ref = _reference_mlp(x, w1, w2, w_out)
    assert out.shape == (B, S, E)
    # bf16 matmul operands (f32 accumulation) + approx reciprocal -> relaxed tol.
    assert jnp.allclose(out, ref, atol=5e-2, rtol=5e-2), "mismatch vs reference"

    print("KERNEL_OK")
</pallas_src>

<mosaic_0001>
module attributes {stable_mosaic.version = 11 : i64} {
  func.func @_mlp_block_kernel(%arg0: i32, %arg1: memref<16x128xbf16, #tpu.memory_space<vmem>>, %arg2: memref<128x512xbf16, #tpu.memory_space<vmem>>, %arg3: memref<256x128xbf16, #tpu.memory_space<vmem>>, %arg4: memref<16x128xf32, #tpu.memory_space<vmem>>) attributes {dimension_semantics = [#tpu.dimension_semantics<parallel>], iteration_bounds = array<i64: 1>, scalar_prefetch = 0 : i64, scratch_operands = 0 : i64, tpu.core_type = #tpu.core_type<tc>, window_params = [{transform_indices = @transform_0, window_bounds = array<i64: 16, 128>}, {pipeline_mode = #tpu.pipeline_mode<synchronous>, transform_indices = @transform_1, window_bounds = array<i64: 128, 512>}, {pipeline_mode = #tpu.pipeline_mode<synchronous>, transform_indices = @transform_2, window_bounds = array<i64: 256, 128>}, {transform_indices = @transform_3, window_bounds = array<i64: 16, 128>}]} {
    %c0 = arith.constant 0 : index
    %c0_0 = arith.constant 0 : index
    %0 = vector.load %arg1[%c0, %c0_0] : memref<16x128xbf16, #tpu.memory_space<vmem>>, vector<16x128xbf16>
    %c0_1 = arith.constant 0 : index
    %c0_2 = arith.constant 0 : index
    %1 = vector.load %arg2[%c0_1, %c0_2] : memref<128x512xbf16, #tpu.memory_space<vmem>>, vector<128x512xbf16>
    %cst = arith.constant dense<0.000000e+00> : vector<16x512xf32>
    %2 = tpu.matmul %0, %1, %cst {dimension_numbers = #tpu.dot_dimension_numbers<[1], [0], [0], [1], [0, 0, 1, 1], [], []>} : vector<16x128xbf16>, vector<128x512xbf16>, vector<16x512xf32> -> vector<16x512xf32>
    %3 = vector.extract_strided_slice %2 {offsets = [0, 0], sizes = [16, 256], strides = [1, 1]} : vector<16x512xf32> to vector<16x256xf32>
    %4 = vector.extract_strided_slice %2 {offsets = [0, 256], sizes = [16, 256], strides = [1, 1]} : vector<16x512xf32> to vector<16x256xf32>
    %cst_3 = arith.constant 0.000000e+00 : f32
    %5 = vector.broadcast %cst_3 : f32 to vector<16x256xf32>
    %6 = arith.subf %5, %3 : vector<16x256xf32>
    %7 = math.exp %6 : vector<16x256xf32>
    %cst_4 = arith.constant 1.000000e+00 : f32
    %8 = vector.broadcast %cst_4 : f32 to vector<16x256xf32>
    %9 = arith.addf %8, %7 : vector<16x256xf32>
    %10 = tpu.reciprocal %9 {approx = true} : vector<16x256xf32> -> vector<16x256xf32>
    %11 = arith.mulf %3, %10 : vector<16x256xf32>
    %12 = arith.mulf %11, %4 : vector<16x256xf32>
    %13 = arith.truncf %12 : vector<16x256xf32> to vector<16x256xbf16>
    %c0_5 = arith.constant 0 : index
    %c0_6 = arith.constant 0 : index
    %14 = vector.load %arg3[%c0_5, %c0_6] : memref<256x128xbf16, #tpu.memory_space<vmem>>, vector<256x128xbf16>
    %cst_7 = arith.constant dense<0.000000e+00> : vector<16x128xf32>
    %15 = tpu.matmul %13, %14, %cst_7 {dimension_numbers = #tpu.dot_dimension_numbers<[1], [0], [0], [1], [0, 0, 1, 1], [], []>} : vector<16x256xbf16>, vector<256x128xbf16>, vector<16x128xf32> -> vector<16x128xf32>
    %c0_8 = arith.constant 0 : index
    %c0_9 = arith.constant 0 : index
    %16 = vector.load %arg4[%c0_8, %c0_9] : memref<16x128xf32, #tpu.memory_space<vmem>>, vector<16x128xf32>
    tpu.vector_store %arg4[%c0_8, %c0_9], %15 {strides = array<i32>} : memref<16x128xf32, #tpu.memory_space<vmem>>, vector<16x128xf32>,
    return
  }
  func.func @transform_0(%arg0: i32) -> (i32, i32) {
    %c0_i32 = arith.constant 0 : i32
    %c0_i32_0 = arith.constant 0 : i32
    return %arg0, %c0_i32 : i32, i32
  }
  func.func @transform_1(%arg0: i32) -> (i32, i32) {
    %c0_i32 = arith.constant 0 : i32
    %c0_i32_0 = arith.constant 0 : i32
    %c0_i32_1 = arith.constant 0 : i32
    return %c0_i32, %c0_i32_0 : i32, i32
  }
  func.func @transform_2(%arg0: i32) -> (i32, i32) {
    %c0_i32 = arith.constant 0 : i32
    %c0_i32_0 = arith.constant 0 : i32
    %c0_i32_1 = arith.constant 0 : i32
    return %c0_i32, %c0_i32_0 : i32, i32
  }
  func.func @transform_3(%arg0: i32) -> (i32, i32) {
    %c0_i32 = arith.constant 0 : i32
    %c0_i32_0 = arith.constant 0 : i32
    return %arg0, %c0_i32 : i32, i32
  }
}

</mosaic_0001>

<bundles_post_ra>
// kernel: mlp_block_prepared.1
= control target key start
LH: loop header
LB: loop body
LE: loop exit
PB: predicated region body
PF: predicated region fallthrough
CT: control target
= control target key end

     0   :  { %8 = vsyncpa [#allocation3], 0  ;;  %s781_s0 = inlined_call_operand.vmem [shape: bf16[16,128], index: 0, kind: input, shape index: {}]   ;;  %s782_s1 = inlined_call_operand.hbm [shape: bf16[128,512], index: 1, kind: input, shape index: {}]   ;;  %s783_s2 = inlined_call_operand.hbm [shape: bf16[256,128], index: 2, kind: input, shape index: {}]   ;;  %s784_s3 = inlined_call_operand.vmem [shape: f32[16,128], index: 3, kind: output, shape index: {}]  }
   0x1   :  { %9 = vsyncpa [#allocation5], 0  ;;  %s739_s12 = smov [#allocation2]  }
   0x2   :  { %s17_s13 = sshll.u32 %s739_s12, 4  ;;  %s18_s13 = int_to_ptr.vmem [resolvable:$true] %s17_s13 }
   0x3   :  { %s703_s14 = scalar_lea.vmem %s18_s13, 4096  ;;  %p708_p1 = scmp.lt.s32.totalorder %s18_s13, %s18_s13 }
   0x4   :  { %p704_p0 = scmp.ne.s32.totalorder %s18_s13, %s703_s14  ;;  %p709_p2 = scmp.lt.s32.totalorder %s703_s14, %s703_s14 }
   0x6   :  { %p710_p3 = por %p709_p2, %p708_p1 }
   0x8   :  { %p711_p4 = pnand %p710_p3, %p704_p0 }
   0xa   :  { %714 = shalt.err (!%p711_p4)
}
   0xb   :  { %s740_s15 = smov 256   ;;  %s741_s16 = smov 16  }
   0xc   :  { %23 = dma.hbm_to_vmem [thread:$0]  %s782_s1, 4096, %s18_s13, [#allocation3], %s740_s15, %s740_s15, %s741_s16  }
   0xd   :  { %s742_s19 = smov [#allocation4]  }
   0xe   :  { %s29_s20 = sshll.u32 %s742_s19, 4  ;;  %s30_s20 = int_to_ptr.vmem [resolvable:$true] %s29_s20 }
   0xf   :  { %s723_s21 = scalar_lea.vmem %s30_s20, 2048  ;;  %p728_p6 = scmp.lt.s32.totalorder %s30_s20, %s30_s20 }
  0x10   :  { %p724_p5 = scmp.ne.s32.totalorder %s30_s20, %s723_s21  ;;  %p729_p7 = scmp.lt.s32.totalorder %s723_s21, %s723_s21 }
  0x12   :  { %p730_p8 = por %p729_p7, %p728_p6 }
  0x14   :  { %p731_p9 = pnand %p730_p8, %p724_p5 }
  0x16   :  { %734 = shalt.err (!%p731_p9)
}
  0x17   :  { %s743_s22 = smov 64   ;;  %s744_s23 = smov 4  }
  0x18   :  { %35 = dma.hbm_to_vmem [thread:$0]  %s783_s2, 2048, %s30_s20, [#allocation5], %s743_s22, %s743_s22, %s744_s23  }
  0x19   :  { %735 = dma.done.wait [#allocation3], 4096  }
  0x1a   :  { %736 = vsyncadd [#allocation3], 4294963200 }
  0x1b   :  { %737 = dma.done.wait [#allocation5], 2048  }
  0x1c   :  { %738 = vsyncadd [#allocation5], 4294965248  ;;  %v745_v0 = vmov 0   ;;  %v614_v1 = vld [vmem:[#allocation2 + $0xe4] ss:$16 sps:$4 sm:$0xff]   ;;  %v663_v34 = vld [vmem:[#allocation4 + $0x78] sm:$0xff]  }
  0x1d   :  { %275 = vmatprep.mubr.bf16.mxu0 %v745_v0  ;;  %318 = vmatprep.mubr.bf16.mxu1 %v745_v0  ;;  %v616_v2 = vld [vmem:[#allocation2 + $0xe0] ss:$16 sps:$4 sm:$0xff]   ;;  %v617_v3 = vld [vmem:[#allocation2 + $0xc4] ss:$16 sps:$4 sm:$0xff]   ;;  %v638_v9 = vld [vmem:[#allocation2 + $0xec] ss:$16 sps:$4 sm:$0xff]  }
  0x1e   :  { %243 = vmatprep.subr.bf16.mxu0 %v614_v1  ;;  %v619_v4 = vld [vmem:[#allocation2 + $0xc0] ss:$16 sps:$4 sm:$0xff]   ;;  %v620_v5 = vld [vmem:[#allocation2 + $0xa4] ss:$16 sps:$4 sm:$0xff]   ;;  %v640_v10 = vld [vmem:[#allocation2 + $0xe8] ss:$16 sps:$4 sm:$0xff]   ;;  %286 = vmatprep.subr.bf16.mxu1 %v638_v9 }
  0x1f   :  { %244 = vmatpush1.bf16.msra.mxu0 %v616_v2  ;;  %v622_v6 = vld [vmem:[#allocation2 + $0xa0] ss:$16 sps:$4 sm:$0xff]   ;;  %v623_v7 = vld [vmem:[#allocation2 + $0x84] ss:$16 sps:$4 sm:$0xff]   ;;  %v642_v12 = vld [vmem:[#allocation2 + $0xcc] ss:$16 sps:$4 sm:$0xff]   ;;  %287 = vmatpush1.bf16.msra.mxu1 %v640_v10 }
  0x20   :  { %245 = vmatprep.subr.bf16.mxu0 %v617_v3  ;;  %v625_v8 = vld [vmem:[#allocation2 + $0x80] ss:$16 sps:$4 sm:$0xff]   ;;  %v626_v11 = vld [vmem:[#allocation2 + $0x64] ss:$16 sps:$4 sm:$0xff]   ;;  %v644_v13 = vld [vmem:[#allocation2 + $0xc8] ss:$16 sps:$4 sm:$0xff]   ;;  %288 = vmatprep.subr.bf16.mxu1 %v642_v12 }
  0x21   :  { %v628_v14 = vld [vmem:[#allocation2 + $0x60] ss:$16 sps:$4 sm:$0xff]   ;;  %v645_v15 = vld [vmem:[#allocation2 + $0xac] ss:$16 sps:$4 sm:$0xff]   ;;  %v629_v16 = vld [vmem:[#allocation2 + $0x44] ss:$16 sps:$4 sm:$0xff]  }
  0x22   :  { %v647_v17 = vld [vmem:[#allocation2 + $0xa8] ss:$16 sps:$4 sm:$0xff]   ;;  %v631_v18 = vld [vmem:[#allocation2 + $0x40] ss:$16 sps:$4 sm:$0xff]   ;;  %v648_v19 = vld [vmem:[#allocation2 + $0x8c] ss:$16 sps:$4 sm:$0xff]  }
  0x23   :  { %246 = vmatpush1.bf16.msra.mxu0 %v619_v4  ;;  %289 = vmatpush1.bf16.msra.mxu1 %v644_v13  ;;  %v632_v20 = vld [vmem:[#allocation2 + $0x24] ss:$16 sps:$4 sm:$0xff]   ;;  %v634_v21 = vld [vmem:[#allocation2 + $0x20] ss:$16 sps:$4 sm:$0xff]   ;;  %v650_v22 = vld [vmem:[#allocation2 + $0x88] ss:$16 sps:$4 sm:$0xff]  }
  0x24   :  { %247 = vmatprep.subr.bf16.mxu0 %v620_v5  ;;  %290 = vmatprep.subr.bf16.mxu1 %v645_v15  ;;  %v635_v23 = vld [vmem:[#allocation2 + $0x4] ss:$16 sps:$4 sm:$0xff]   ;;  %v651_v24 = vld [vmem:[#allocation2 + $0x6c] ss:$16 sps:$4 sm:$0xff]   ;;  %v653_v25 = vld [vmem:[#allocation2 + $0x68] ss:$16 sps:$4 sm:$0xff]  }
  0x25   :  { %v637_v26 = vld [vmem:[#allocation2] ss:$16 sps:$4 sm:$0xff]   ;;  %v654_v27 = vld [vmem:[#allocation2 + $0x4c] ss:$16 sps:$4 sm:$0xff]   ;;  %v656_v29 = vld [vmem:[#allocation2 + $0x48] ss:$16 sps:$4 sm:$0xff]  }
  0x26   :  { %v641_v28 = vld [vmem:[%s781_s0] sm:$0xff]   ;;  %v657_v30 = vld [vmem:[#allocation2 + $0x2c] ss:$16 sps:$4 sm:$0xff]   ;;  %v659_v31 = vld [vmem:[#allocation2 + $0x28] ss:$16 sps:$4 sm:$0xff]  }
  0x27   :  { %248 = vmatpush1.bf16.msra.mxu0 %v622_v6  ;;  %291 = vmatpush1.bf16.msra.mxu1 %v647_v17  ;;  %v660_v32 = vld [vmem:[#allocation2 + $0xc] ss:$16 sps:$4 sm:$0xff]   ;;  %v662_v33 = vld [vmem:[#allocation2 + $0x8] ss:$16 sps:$4 sm:$0xff]   ;;  %v665_v36 = vld [vmem:[#allocation4 + $0x70] sm:$0xff]  }
  0x28   :  { %249 = vmatprep.subr.bf16.mxu0 %v623_v7  ;;  %292 = vmatprep.subr.bf16.mxu1 %v648_v19  ;;  %v664_v35 = vld [vmem:[#allocation4 + $0x38] sm:$0xff]   ;;  %v666_v37 = vld [vmem:[#allocation4 + $0x30] sm:$0xff]   ;;  %v667_v38 = vld [vmem:[#allocation4 + $0x68] sm:$0xff]  }
  0x29   :  { %v668_v39 = vld [vmem:[#allocation4 + $0x28] sm:$0xff]   ;;  %v669_v40 = vld [vmem:[#allocation4 + $0x60] sm:$0xff]   ;;  %v671_v42 = vld [vmem:[#allocation4 + $0x58] sm:$0xff]  }
  0x2a   :  { %v670_v41 = vld [vmem:[#allocation4 + $0x20] sm:$0xff]   ;;  %v672_v43 = vld [vmem:[#allocation4 + $0x18] sm:$0xff]   ;;  %v673_v44 = vld [vmem:[#allocation4 + $0x50] sm:$0xff]  }
  0x2b   :  { %250 = vmatpush1.bf16.msra.mxu0 %v625_v8  ;;  %293 = vmatpush1.bf16.msra.mxu1 %v650_v22  ;;  %v674_v45 = vld [vmem:[#allocation4 + $0x10] sm:$0xff]   ;;  %v675_v46 = vld [vmem:[#allocation4 + $0x48] sm:$0xff]   ;;  %v677_v48 = vld [vmem:[#allocation4 + $0x40] sm:$0xff]  }
  0x2c   :  { %251 = vmatprep.subr.bf16.mxu0 %v626_v11  ;;  %294 = vmatprep.subr.bf16.mxu1 %v651_v24  ;;  %v676_v47 = vld [vmem:[#allocation4 + $0x8] sm:$0xff]   ;;  %v678_v49 = vld [vmem:[#allocation4] sm:$0xff]  }
  0x2f   :  { %252 = vmatpush1.bf16.msra.mxu0 %v628_v14  ;;  %295 = vmatpush1.bf16.msra.mxu1 %v653_v25 }
  0x30   :  { %253 = vmatprep.subr.bf16.mxu0 %v629_v16  ;;  %296 = vmatprep.subr.bf16.mxu1 %v654_v27 }
  0x33   :  { %254 = vmatpush1.bf16.msra.mxu0 %v631_v18  ;;  %297 = vmatpush1.bf16.msra.mxu1 %v656_v29 }
  0x34   :  { %255 = vmatprep.subr.bf16.mxu0 %v632_v20  ;;  %298 = vmatprep.subr.bf16.mxu1 %v657_v30 }
  0x37   :  { %256 = vmatpush1.bf16.msra.mxu0 %v634_v21  ;;  %299 = vmatpush1.bf16.msra.mxu1 %v659_v31 }
  0x38   :  { %257 = vmatprep.subr.bf16.mxu0 %v635_v23  ;;  %300 = vmatprep.subr.bf16.mxu1 %v660_v32 }
  0x3b   :  { %258 = vmatpush1.bf16.msra.mxu0 %v637_v26  ;;  %301 = vmatpush1.bf16.msra.mxu1 %v662_v33 }
  0x3c   :  { %585 = vmatprep.subr.bf16.mxu0 %v663_v34 }
  0x3e   :  { %276 = vmatmul.mubr.bf16.vlgmr.msra.gmra.mxu0 %v641_v28  ;;  %319 = vmatmul.mubr.bf16.vlgmr.msra.gmra.mxu1 %v641_v28 }
  0x3f   :  { %586 = vmatpush3.bf16.msra.mxu0 %v664_v35 }
  0x40   :  { %587 = vmatprep.subr.bf16.mxu0 %v665_v36 }
  0x43   :  { %588 = vmatpush3.bf16.msra.mxu0 %v666_v37 }
  0x44   :  { %589 = vmatprep.subr.bf16.mxu0 %v667_v38 }
  0x47   :  { %590 = vmatpush3.bf16.msra.mxu0 %v668_v39 }
  0x48   :  { %591 = vmatprep.subr.bf16.mxu0 %v669_v40 }
  0x4b   :  { %592 = vmatpush3.bf16.msra.mxu0 %v670_v41 }
  0x4c   :  { %593 = vmatprep.subr.bf16.mxu0 %v671_v42 }
  0x4f   :  { %594 = vmatpush3.bf16.msra.mxu0 %v672_v43 }
  0x50   :  { %595 = vmatprep.subr.bf16.mxu0 %v673_v44 }
  0x53   :  { %596 = vmatpush3.bf16.msra.mxu0 %v674_v45 }
  0x54   :  { %597 = vmatprep.subr.bf16.mxu0 %v675_v46 }
  0x57   :  { %598 = vmatpush3.bf16.msra.mxu0 %v676_v47 }
  0x58   :  { %599 = vmatprep.subr.bf16.mxu0 %v677_v48 }
  0x5b   :  { %600 = vmatpush3.bf16.msra.mxu0 %v678_v49 }
  0xfe   :  { %v277_v50 = vpop.f32.mrf.mxu0  ;;  %v320_v6 = vpop.f32.mrf.mxu1 }
  0xff   :  { %v329_v51 = vsub.f32 0.0, %v277_v50 }
 0x100   :  { %v279_v52 = vpop.f32.mrf.mxu0  ;;  %v322_v7 = vpop.f32.mrf.mxu1 }
 0x101   :  { %v333_v53 = vmul.f32 1.442695, %v329_v51  ;;  %v330_v54 = vsub.f32 0.0, %v279_v52 }
 0x102   :  { %v281_v55 = vpop.f32.mrf.mxu0  ;;  %v324_v11 = vpop.f32.mrf.mxu1 }
 0x103   :  { %679 = vpow2.f32 %v333_v53  ;;  %v335_v56 = vmul.f32 1.442695, %v330_v54  ;;  %v331_v57 = vsub.f32 0.0, %v281_v55 }
 0x104   :  { %v283_v58 = vpop.f32.mrf.mxu0  ;;  %v326_v18 = vpop.f32.mrf.mxu1 }
 0x105   :  { %681 = vpow2.f32 %v335_v56  ;;  %v337_v59 = vmul.f32 1.442695, %v331_v57  ;;  %v332_v60 = vsub.f32 0.0, %v283_v58 }
 0x107   :  { %683 = vpow2.f32 %v337_v59  ;;  %v339_v61 = vmul.f32 1.442695, %v332_v60 }
 0x109   :  { %685 = vpow2.f32 %v339_v61 }
 0x110   :  { %v680_v62 = vpop.eup %679 }
 0x111   :  { %v341_v0 = vadd.f32 1.0, %v680_v62 }
 0x112   :  { %v682_v63 = vpop.eup %681 }
 0x113   :  { %v342_v1 = vadd.f32 1.0, %v682_v63 }
 0x114   :  { %v684_v2 = vpop.eup %683 }
 0x115   :  { %687 = vrcp.f32 %v342_v1  ;;  %v343_v3 = vadd.f32 1.0, %v684_v2 }
 0x116   :  { %v686_v4 = vpop.eup %685  ;;  %689 = vrcp.f32 %v341_v0 }
 0x117   :  { %691 = vrcp.f32 %v343_v3  ;;  %v344_v5 = vadd.f32 1.0, %v686_v4 }
 0x119   :  { %693 = vrcp.f32 %v344_v5 }
 0x122   :  { %v688_v8 = vpop.eup %687 }
 0x123   :  { %v690_v9 = vpop.eup %689  ;;  %v350_v12 = vmul.f32 %v688_v8, %v279_v52 }
 0x124   :  { %v692_v10 = vpop.eup %691  ;;  %v349_v15 = vmul.f32 %v690_v9, %v277_v50 }
 0x125   :  { %v351_v13 = vmul.f32 %v692_v10, %v281_v55  ;;  %v354_v19 = vmul.f32 %v350_v12, %v322_v7 }
 0x126   :  { %v694_v14 = vpop.eup %693  ;;  %v353_v21 = vmul.f32 %v349_v15, %v320_v6 }
 0x127   :  { %v352_v16 = vmul.f32 %v694_v14, %v283_v58  ;;  %v355_v17 = vmul.f32 %v351_v13, %v324_v11 }
 0x129   :  { %v356_v20 = vmul.f32 %v352_v16, %v326_v18  ;;  %v357_v23 = vpack.c.bf16 %v355_v17, %v353_v21 }
 0x12b   :  { %v358_v22 = vpack.c.bf16 %v356_v20, %v354_v19 }
 0x12d   :  { %519 = vmatprep.mubr.bf16.mxu0 %v358_v22 }
 0x12e   :  { %520 = vmatmul.mubr.bf16.vlgmr.msra.gmra.mxu0 %v357_v23 }
 0x1ee   :  { %v601_v24 = vpop.f32.mrf.mxu0 }
 0x1f0   :  { %v602_v25 = vpop.f32.mrf.mxu0 }
 0x1f1   :  { %v603_v26 = vadd.f32 %v602_v25, %v601_v24 }
 0x1f2   :  { %v604_v27 = vpop.f32.mrf.mxu0 }
 0x1f3   :  { %528 = vst [vmem:[%s784_s3] sm:$0xff] %v603_v26 }
 0x1f4   :  { %v605_v28 = vpop.f32.mrf.mxu0 }
 0x1f5   :  { %v606_v29 = vadd.f32 %v605_v28, %v604_v27 }
 0x1f7   :  { %529 = vst [vmem:[%s784_s3 + $0x8] sm:$0xff] %v606_v29 }
 0x1f8   :  { %534 = vsyncpa [#allocation3], 1 }
 0x1f9   :  { %535 = vsyncpa [#allocation5], 1 }

</bundles_post_ra>
